<compile_context>
chip_gen: v6e
topology: v6e:2x2x1
jax: 0.10.0
libtpu: 0.0.40
codegen_flags: <defaults>
</compile_context>

<pallas_src>
import jax
import jax.numpy as jnp
from jax.experimental import pallas as pl
from jax.experimental.pallas import tpu as pltpu

KH = KW = 3   # 3x3 conv, stride 1, SAME padding


def _conv_rows_kernel(x_ref, w_ref, b_ref, o_ref):
    """Fused 3x3 conv + bias + ReLU for one image.

    x_ref : (1, H+2, (W+2)*Cin)     bf16 halo-padded image rows
    w_ref : (KH, (W+2)*Cin, W*Cout) bf16 block-Toeplitz packed conv weights
    b_ref : (1, W*Cout)             f32  bias tiled across W
    o_ref : (1, H, W*Cout)          f32  lane-dense output rows
    """
    H = o_ref.shape[1]
    x = x_ref[0]                                      # (H+2, KIN), one VMEM load
    acc = jnp.dot(x[0:H, :], w_ref[0], preferred_element_type=jnp.float32)
    for kh in range(1, w_ref.shape[0]):               # static, unrolled (KH=3)
        acc = acc + jnp.dot(x[kh:kh + H, :], w_ref[kh],
                            preferred_element_type=jnp.float32)
    acc = acc + b_ref[...]                            # broadcast bias (VPU)
    o_ref[0] = jnp.maximum(acc, 0.0).astype(o_ref.dtype)


def _conv_relu_pallas(x_halo, w_packed, bias_tiled):
    """(B, H+2, (W+2)*Cin) bf16 -> (B, H, W*Cout) f32."""
    B, Hp, KIN = x_halo.shape
    KH_, _, NOUT = w_packed.shape
    H = Hp - (KH_ - 1)
    return pl.pallas_call(
        _conv_rows_kernel,
        out_shape=jax.ShapeDtypeStruct((B, H, NOUT), jnp.float32),
        grid=(B,),
        in_specs=[
            pl.BlockSpec((1, Hp, KIN), lambda b: (b, 0, 0)),
            pl.BlockSpec((KH_, KIN, NOUT), lambda b: (0, 0, 0)),  # resident
            pl.BlockSpec((1, NOUT), lambda b: (0, 0)),
        ],
        out_specs=pl.BlockSpec((1, H, NOUT), lambda b: (b, 0, 0)),
        compiler_params=pltpu.CompilerParams(
            dimension_semantics=("parallel",)),
    )(x_halo, w_packed, bias_tiled)


def _pack_weights(w, W):
    """Pack (KH,KW,Cin,Cout) conv weights into KH block-Toeplitz matrices of
    shape ((W+KW-1)*Cin, W*Cout): entry [xin*Cin+ci, x*Cout+co] holds
    w[kh, xin-x, ci, co] when 0 <= xin-x < KW, else 0."""
    KH_, KW_, Cin, Cout = w.shape
    xin = jnp.arange(W + KW_ - 1)
    xout = jnp.arange(W)
    kw = jnp.arange(KW_)
    sel = (xin[None, :, None]
           == (xout[None, None, :] + kw[:, None, None])).astype(w.dtype)
    M = jnp.einsum('kXx,hkio->hXixo', sel, w)          # (KH, W+2, Cin, W, Cout)
    return M.reshape(KH_, (W + KW_ - 1) * Cin, W * Cout)


@jax.jit
def _forward(x_nchw, w, b):
    B, C, H, W = x_nchw.shape
    KH_, KW_, Cin, Cout = w.shape
    pad = KW_ // 2
    # NCHW -> halo-padded NHWC rows with (x, cin) flattened into lanes.
    x = jnp.transpose(x_nchw, (0, 2, 3, 1))
    x = jnp.pad(x, ((0, 0), (pad, pad), (pad, pad), (0, 0)))
    x = x.reshape(B, H + 2 * pad, (W + 2 * pad) * Cin).astype(jnp.bfloat16)
    w_packed = _pack_weights(w, W).astype(jnp.bfloat16)
    bias_tiled = jnp.tile(b, W).reshape(1, W * Cout).astype(jnp.float32)
    out = _conv_relu_pallas(x, w_packed, bias_tiled)     # (B, H, W*Cout) f32
    out = out.reshape(B, H, W, Cout)
    return jnp.transpose(out, (0, 3, 1, 2))              # back to NCHW


class ModelSWTPallas:
    """JAX/Pallas equivalent of Model_SWT wrapping Conv2d(4,8,3,pad=1)+ReLU."""
    # TODO(synk): Model_SWT's wrapped `model` is user-supplied; only the
    #             delegation semantics plus this synthetic inner conv model
    #             are implemented here.

    def __init__(self, cin=4, cout=8, key=jax.random.PRNGKey(0)):
        self.cin, self.cout = cin, cout
        kw_key, kb_key = jax.random.split(key)
        fan_in = cin * KH * KW
        self.w = (jax.random.normal(kw_key, (KH, KW, cin, cout), jnp.float32)
                  * (2.0 / fan_in) ** 0.5)               # HWIO
        self.b = jax.random.normal(kb_key, (cout,), jnp.float32) * 0.01

    def __call__(self, x_nchw):
        # Model_SWT.forward(x) == self.model(x): straight delegation.
        assert x_nchw.shape[1] == self.cin
        return _forward(x_nchw, self.w, self.b)


def _reference(x_nchw, w, b):
    # Pure-JAX f32 reference for sanity checking the kernel.
    x_nhwc = jnp.transpose(x_nchw, (0, 2, 3, 1))
    out = jax.lax.conv_general_dilated(
        x_nhwc, w, window_strides=(1, 1), padding="SAME",
        dimension_numbers=("NHWC", "HWIO", "NHWC"))
    out = jnp.maximum(out + b[None, None, None, :], 0.0)
    return jnp.transpose(out, (0, 3, 1, 2))


if __name__ == "__main__":
    key = jax.random.PRNGKey(0)
    kx, kp = jax.random.split(key)

    B, C, H, W = 2, 4, 16, 16
    x = jax.random.normal(kx, (B, C, H, W), jnp.float32)

    model = ModelSWTPallas(cin=C, cout=8, key=kp)
    out = jax.block_until_ready(model(x))

    ref = _reference(x, model.w, model.b)
    assert out.shape == (B, 8, H, W), out.shape
    # bf16 input/weight streams (f32 accumulation) -> loosened tolerance.
    assert jnp.allclose(out, ref, atol=3e-2, rtol=3e-2), "mismatch vs reference"

    print("KERNEL_OK")
</pallas_src>

<mosaic_0001>
module attributes {stable_mosaic.version = 11 : i64} {
  func.func @_conv_rows_kernel(%arg0: i32, %arg1: memref<1x18x72xbf16, #tpu.memory_space<vmem>>, %arg2: memref<3x72x128xbf16, #tpu.memory_space<vmem>>, %arg3: memref<1x128xf32, #tpu.memory_space<vmem>>, %arg4: memref<1x16x128xf32, #tpu.memory_space<vmem>>) attributes {dimension_semantics = [#tpu.dimension_semantics<parallel>], iteration_bounds = array<i64: 2>, scalar_prefetch = 0 : i64, scratch_operands = 0 : i64, tpu.core_type = #tpu.core_type<tc>, window_params = [{transform_indices = @transform_0, window_bounds = array<i64: 1, 18, 72>}, {pipeline_mode = #tpu.pipeline_mode<synchronous>, transform_indices = @transform_1, window_bounds = array<i64: 3, 72, 128>}, {pipeline_mode = #tpu.pipeline_mode<synchronous>, transform_indices = @transform_2, window_bounds = array<i64: 1, 128>}, {transform_indices = @transform_3, window_bounds = array<i64: 1, 16, 128>}]} {
    %c0 = arith.constant 0 : index
    %c0_0 = arith.constant 0 : index
    %c0_1 = arith.constant 0 : index
    %0 = vector.load %arg1[%c0, %c0_0, %c0_1] : memref<1x18x72xbf16, #tpu.memory_space<vmem>>, vector<1x18x72xbf16>
    %1 = vector.shape_cast %0 : vector<1x18x72xbf16> to vector<18x72xbf16>
    %2 = vector.extract_strided_slice %1 {offsets = [0, 0], sizes = [16, 72], strides = [1, 1]} : vector<18x72xbf16> to vector<16x72xbf16>
    %c0_2 = arith.constant 0 : index
    %c0_3 = arith.constant 0 : index
    %c0_4 = arith.constant 0 : index
    %3 = vector.load %arg2[%c0_2, %c0_3, %c0_4] : memref<3x72x128xbf16, #tpu.memory_space<vmem>>, vector<1x72x128xbf16>
    %4 = vector.shape_cast %3 : vector<1x72x128xbf16> to vector<72x128xbf16>
    %cst = arith.constant dense<0.000000e+00> : vector<16x128xf32>
    %5 = tpu.matmul %2, %4, %cst {dimension_numbers = #tpu.dot_dimension_numbers<[1], [0], [0], [1], [0, 0, 1, 1], [], []>} : vector<16x72xbf16>, vector<72x128xbf16>, vector<16x128xf32> -> vector<16x128xf32>
    %6 = vector.extract_strided_slice %1 {offsets = [1, 0], sizes = [16, 72], strides = [1, 1]} : vector<18x72xbf16> to vector<16x72xbf16>
    %c1 = arith.constant 1 : index
    %c0_5 = arith.constant 0 : index
    %c0_6 = arith.constant 0 : index
    %7 = vector.load %arg2[%c1, %c0_5, %c0_6] : memref<3x72x128xbf16, #tpu.memory_space<vmem>>, vector<1x72x128xbf16>
    %8 = vector.shape_cast %7 : vector<1x72x128xbf16> to vector<72x128xbf16>
    %cst_7 = arith.constant dense<0.000000e+00> : vector<16x128xf32>
    %9 = tpu.matmul %6, %8, %cst_7 {dimension_numbers = #tpu.dot_dimension_numbers<[1], [0], [0], [1], [0, 0, 1, 1], [], []>} : vector<16x72xbf16>, vector<72x128xbf16>, vector<16x128xf32> -> vector<16x128xf32>
    %10 = arith.addf %5, %9 : vector<16x128xf32>
    %11 = vector.extract_strided_slice %1 {offsets = [2, 0], sizes = [16, 72], strides = [1, 1]} : vector<18x72xbf16> to vector<16x72xbf16>
    %c2 = arith.constant 2 : index
    %c0_8 = arith.constant 0 : index
    %c0_9 = arith.constant 0 : index
    %12 = vector.load %arg2[%c2, %c0_8, %c0_9] : memref<3x72x128xbf16, #tpu.memory_space<vmem>>, vector<1x72x128xbf16>
    %13 = vector.shape_cast %12 : vector<1x72x128xbf16> to vector<72x128xbf16>
    %cst_10 = arith.constant dense<0.000000e+00> : vector<16x128xf32>
    %14 = tpu.matmul %11, %13, %cst_10 {dimension_numbers = #tpu.dot_dimension_numbers<[1], [0], [0], [1], [0, 0, 1, 1], [], []>} : vector<16x72xbf16>, vector<72x128xbf16>, vector<16x128xf32> -> vector<16x128xf32>
    %15 = arith.addf %10, %14 : vector<16x128xf32>
    %c0_11 = arith.constant 0 : index
    %c0_12 = arith.constant 0 : index
    %16 = vector.load %arg3[%c0_11, %c0_12] : memref<1x128xf32, #tpu.memory_space<vmem>>, vector<1x128xf32>
    %17 = vector.broadcast %16 : vector<1x128xf32> to vector<16x128xf32>
    %18 = arith.addf %15, %17 : vector<16x128xf32>
    %cst_13 = arith.constant 0.000000e+00 : f32
    %19 = vector.broadcast %cst_13 : f32 to vector<16x128xf32>
    %20 = arith.maximumf %18, %19 : vector<16x128xf32>
    %c0_14 = arith.constant 0 : index
    %c0_15 = arith.constant 0 : index
    %c0_16 = arith.constant 0 : index
    %21 = vector.load %arg4[%c0_14, %c0_15, %c0_16] : memref<1x16x128xf32, #tpu.memory_space<vmem>>, vector<1x16x128xf32>
    %22 = vector.shape_cast %21 : vector<1x16x128xf32> to vector<16x128xf32>
    %23 = vector.shape_cast %20 : vector<16x128xf32> to vector<1x16x128xf32>
    tpu.vector_store %arg4[%c0_14, %c0_15, %c0_16], %23 {strides = array<i32>} : memref<1x16x128xf32, #tpu.memory_space<vmem>>, vector<1x16x128xf32>,
    return
  }
  func.func @transform_0(%arg0: i32) -> (i32, i32, i32) {
    %c0_i32 = arith.constant 0 : i32
    %c0_i32_0 = arith.constant 0 : i32
    %c0_i32_1 = arith.constant 0 : i32
    return %arg0, %c0_i32, %c0_i32_0 : i32, i32, i32
  }
  func.func @transform_1(%arg0: i32) -> (i32, i32, i32) {
    %c0_i32 = arith.constant 0 : i32
    %c0_i32_0 = arith.constant 0 : i32
    %c0_i32_1 = arith.constant 0 : i32
    %c0_i32_2 = arith.constant 0 : i32
    return %c0_i32, %c0_i32_0, %c0_i32_1 : i32, i32, i32
  }
  func.func @transform_2(%arg0: i32) -> (i32, i32) {
    %c0_i32 = arith.constant 0 : i32
    %c0_i32_0 = arith.constant 0 : i32
    %c0_i32_1 = arith.constant 0 : i32
    return %c0_i32, %c0_i32_0 : i32, i32
  }
  func.func @transform_3(%arg0: i32) -> (i32, i32, i32) {
    %c0_i32 = arith.constant 0 : i32
    %c0_i32_0 = arith.constant 0 : i32
    %c0_i32_1 = arith.constant 0 : i32
    return %arg0, %c0_i32, %c0_i32_0 : i32, i32, i32
  }
}

</mosaic_0001>

<bundles_post_ra>
// kernel: tile.8
= control target key start
LH: loop header
LB: loop body
LE: loop exit
PB: predicated region body
PF: predicated region fallthrough
CT: control target
= control target key end

     0   :  { %s28_s0 = inlined_call_operand.vmem [shape: f32[8], index: 0, kind: input, shape index: {}]   ;;  %s29_s1 = inlined_call_operand.vmem [shape: f32[16,8], index: 1, kind: output, shape index: {}]  }
   0x1   :  { %v4_v0 = vld [vmem:[%s28_s0] ss:$0 sm:$0xff] }
   0x2   :  { %5 = vst [vmem:[%s29_s1] sm:$0xff] %v4_v0  ;;  %8 = vst [vmem:[%s29_s1 + $0x8] sm:$0xff] %v4_v0 }

// kernel: tile.9
= control target key start
LH: loop header
LB: loop body
LE: loop exit
PB: predicated region body
PF: predicated region fallthrough
CT: control target
= control target key end

     0   :  { %s133_s10 = smov 120   ;;  %s134_s11 = smov 104   ;;  %vm3_vm0 = vcmask 64512   ;;  %vm9_vm1 = vcmask 1048512   ;;  %vm15_vm2 = vcmask 982912   ;;  %vm21_vm3 = vcmask 917312   ;;  %s209_s0 = inlined_call_operand.vmem [shape: f32[16,8], index: 0, kind: input, shape index: {}]   ;;  %s210_s1 = inlined_call_operand.vmem [shape: f32[1,128], index: 1, kind: output, shape index: {}]  }
   0x1   :  { %v103_v0 = vld [vmem:[%s209_s0 + $0xf] sm:$0x1]   ;;  %v105_v1 = vld [vmem:[%s209_s0 + $0xd] sm:$0x1]   ;;  %v104_v2 = vld [vmem:[%s209_s0 + $0xe] sm:$0x1]  }
   0x2   :  { %7 = vrot.lane.b32.xlu0 %v103_v0, %s133_s10  ;;  %19 = vrot.lane.b32.xlu1 %v105_v1, %s134_s11  ;;  %v106_v3 = vld [vmem:[%s209_s0 + $0xc] sm:$0x1]   ;;  %s135_s16 = smov 112   ;;  %s136_s17 = smov 96   ;;  %v107_v4 = vld [vmem:[%s209_s0 + $0xb] sm:$0x1]  }
   0x3   :  { %v108_v5 = vld [vmem:[%s209_s0 + $0xa] sm:$0x1]   ;;  %v2_v6 = vld [vmem:[%s209_s0] sm:$0x1]   ;;  %s137_s24 = smov 88   ;;  %s138_s25 = smov 80  }
   0x4   :  { %4 = vst.msk [vmem:[#allocation0] sm:$0x1] %vm3_vm0, %v2_v6   ;;  %v109_v7 = vld [vmem:[%s209_s0 + $0x9] sm:$0x1]   ;;  %v110_v8 = vld [vmem:[%s209_s0 + $0x8] sm:$0x1]  }
   0x5   :  { %s139_s30 = smov 72   ;;  %s140_s2 = smov 64   ;;  %v111_v9 = vld [vmem:[%s209_s0 + $0x7] sm:$0x1]   ;;  %v112_v10 = vld [vmem:[%s209_s0 + $0x6] sm:$0x1]  }
   0x6   :  { %13 = vrot.lane.b32.xlu0 %v104_v2, %s135_s16  ;;  %25 = vrot.lane.b32.xlu1 %v106_v3, %s136_s17  ;;  %s141_s7 = smov 56   ;;  %s142_s8 = smov 48   ;;  %v113_v11 = vld [vmem:[%s209_s0 + $0x5] sm:$0x1]   ;;  %v114_v12 = vld [vmem:[%s209_s0 + $0x4] sm:$0x1]  }
   0x7   :  { %s143_s13 = smov 40   ;;  %s144_s14 = smov 32   ;;  %v115_v13 = vld [vmem:[%s209_s0 + $0x3] sm:$0x1]   ;;  %v116_v14 = vld [vmem:[%s209_s0 + $0x2] sm:$0x1]  }
   0x8   :  { %s145_s19 = smov 24   ;;  %s146_s20 = smov 16   ;;  %v117_v15 = vld [vmem:[%s209_s0 + $0x1] sm:$0x1]   ;;  %vm27_vm4 = vcmask 851712   ;;  %vm33_vm5 = vcmask 786112  }
   0x9   :  { %s147_s0 = smov 8   ;;  %vm39_vm6 = vcmask 720512   ;;  %vm45_vm7 = vcmask 654912   ;;  %vm51_vm8 = vcmask 589312   ;;  %vm57_vm9 = vcmask 523712  }
   0xa   :  { %31 = vrot.lane.b32.xlu0 %v107_v4, %s137_s24  ;;  %37 = vrot.lane.b32.xlu1 %v108_v5, %s138_s25  ;;  %vm63_vm10 = vcmask 458112   ;;  %vm69_vm11 = vcmask 392512   ;;  %vm75_vm12 = vcmask 326912   ;;  %vm81_vm13 = vcmask 261312  }
   0xb   :  { %vm87_vm14 = vcmask 195712   ;;  %vm93_vm15 = vcmask 130112  }
   0xe   :  { %43 = vrot.lane.b32.xlu0 %v109_v7, %s139_s30  ;;  %49 = vrot.lane.b32.xlu1 %v110_v8, %s140_s2 }
  0x12   :  { %55 = vrot.lane.b32.xlu0 %v111_v9, %s141_s7  ;;  %61 = vrot.lane.b32.xlu1 %v112_v10, %s142_s8 }
  0x16   :  { %67 = vrot.lane.b32.xlu0 %v113_v11, %s143_s13  ;;  %73 = vrot.lane.b32.xlu1 %v114_v12, %s144_s14 }
  0x1a   :  { %79 = vrot.lane.b32.xlu0 %v115_v13, %s145_s19  ;;  %85 = vrot.lane.b32.xlu1 %v116_v14, %s146_s20 }
  0x1e   :  { %91 = vrot.lane.b32.xlu0 %v117_v15, %s147_s0 }
  0x74   :  { %v8_v16 = vpop.permute.xlu0 %7   ;;  %v20_v17 = vpop.permute.xlu1 %19  }
  0x75   :  { %10 = vst.msk [vmem:[#allocation0] sm:$0x1] %vm9_vm1, %v8_v16  }
  0x78   :  { %v14_v18 = vpop.permute.xlu0 %13   ;;  %v26_v19 = vpop.permute.xlu1 %25  }
  0x79   :  { %16 = vst.msk [vmem:[#allocation0] sm:$0x1] %vm15_vm2, %v14_v18  }
  0x7a   :  { %22 = vst.msk [vmem:[#allocation0] sm:$0x1] %vm21_vm3, %v20_v17  }
  0x7b   :  { %28 = vst.msk [vmem:[#allocation0] sm:$0x1] %vm27_vm4, %v26_v19  }
  0x7c   :  { %v32_v20 = vpop.permute.xlu0 %31   ;;  %v38_v21 = vpop.permute.xlu1 %37  }
  0x7d   :  { %34 = vst.msk [vmem:[#allocation0] sm:$0x1] %vm33_vm5, %v32_v20  }
  0x7e   :  { %40 = vst.msk [vmem:[#allocation0] sm:$0x1] %vm39_vm6, %v38_v21  }
  0x80   :  { %v44_v22 = vpop.permute.xlu0 %43   ;;  %v50_v23 = vpop.permute.xlu1 %49  }
  0x81   :  { %46 = vst.msk [vmem:[#allocation0] sm:$0x1] %vm45_vm7, %v44_v22  }
  0x82   :  { %52 = vst.msk [vmem:[#allocation0] sm:$0x1] %vm51_vm8, %v50_v23  }
  0x84   :  { %v56_v24 = vpop.permute.xlu0 %55   ;;  %v62_v25 = vpop.permute.xlu1 %61  }
  0x85   :  { %58 = vst.msk [vmem:[#allocation0] sm:$0x1] %vm57_vm9, %v56_v24  }
  0x86   :  { %64 = vst.msk [vmem:[#allocation0] sm:$0x1] %vm63_vm10, %v62_v25  }
  0x88   :  { %v68_v26 = vpop.permute.xlu0 %67   ;;  %v74_v27 = vpop.permute.xlu1 %73  }
  0x89   :  { %70 = vst.msk [vmem:[#allocation0] sm:$0x1] %vm69_vm11, %v68_v26  }
  0x8a   :  { %76 = vst.msk [vmem:[#allocation0] sm:$0x1] %vm75_vm12, %v74_v27  }
  0x8c   :  { %v80_v28 = vpop.permute.xlu0 %79   ;;  %v86_v29 = vpop.permute.xlu1 %85  }
  0x8d   :  { %82 = vst.msk [vmem:[#allocation0] sm:$0x1] %vm81_vm13, %v80_v28  }
  0x8e   :  { %88 = vst.msk [vmem:[#allocation0] sm:$0x1] %vm87_vm14, %v86_v29  }
  0x90   :  { %v92_v30 = vpop.permute.xlu0 %91  }
  0x91   :  { %94 = vst.msk [vmem:[#allocation0] sm:$0x1] %vm93_vm15, %v92_v30  }
  0x98   :  { %v99_v31 = vld [vmem:[#allocation0] sm:$0x1] }
  0x99   :  { %102 = vst [vmem:[%s210_s1] sm:$0x1] %v99_v31 }

// kernel: _forward.1
= control target key start
LH: loop header
LB: loop body
LE: loop exit
PB: predicated region body
PF: predicated region fallthrough
CT: control target
= control target key end

     0   :  { %s690_s12 = smov 0   ;;  %s786_s0 = inlined_call_operand.vmem [shape: bf16[2,18,72], index: 0, kind: input, shape index: {}]   ;;  %s787_s1 = inlined_call_operand.vmem [shape: bf16[3,72,128], index: 1, kind: input, shape index: {}]   ;;  %s788_s2 = inlined_call_operand.vmem [shape: f32[1,128], index: 2, kind: input, shape index: {}]   ;;  %s789_s3 = inlined_call_operand.vmem [shape: f32[2,16,128], index: 3, kind: output, shape index: {}]  }
   0x1 LB: > { %s522_s13 = sadd.s32 4294967295, %s666_s12   ;;  %p526_p0 = scmp.ge.s32.totalorder %s666_s12, 1  ;;  %s666_s12 = sphi %s690_s12, %s13_s12  }
   0x2   : > { %p137_p1 = scmp.lt.s32.totalorder %s666_s12, 3 }
   0x4   : > { %p138_p2 = pnand %p526_p0, %p137_p1 }
   0x5   : > { %p161_p3 = scmp.lt.s32.totalorder (!%p138_p2), %s522_s13, 1 }
   0x6   : > { %141 = sbr.rel (%p138_p2) target bundleno = 256 (0x100), region = 32 }
   0xb   : > { %v643_v0 = vld [vmem:[%s787_s1 + $0x44] ss:$0 sps:$4 sm:$0xff]   ;;  %vm246_vm0 = vcmask 1043456   ;;  %v668_v1 = vmov 0.0   ;;  %v644_v2 = vld [vmem:[%s787_s1 + $0x20] ss:$0 sps:$4 sm:$0xff]  }
   0xc   : > { %590 = vmatprep.subr.bf16.mxu0 %v668_v1  ;;  %604 = vmatprep.subr.bf16.mxu1 %v668_v1  ;;  %v248_v3 = vsel %vm246_vm0, %v643_v0, 0  ;;  %v321_v4 = vsel %vm246_vm0, %v644_v2, 0  ;;  %v645_v5 = vld [vmem:[%s787_s1 + $0x3c] sm:$0xff]   ;;  %vm669_vm1 = vmmov 0   ;;  %v647_v7 = vld [vmem:[%s787_s1 + $0x34] sm:$0xff]   ;;  %s791_s13 = smov (!%p161_p3, %s522_s13), 1 }
   0xd   : > { %591 = vmatpush3.bf16.msra.mxu0 %v248_v3  ;;  %605 = vmatpush3.bf16.msra.mxu1 %v321_v4  ;;  %v646_v6 = vld [vmem:[%s787_s1 + $0x18] sm:$0xff]   ;;  %v648_v8 = vld [vmem:[%s787_s1 + $0x10] sm:$0xff]   ;;  %s632_s26 = smul.u32 12, %s791_s13  ;;  %v650_v10 = vld [vmem:[%s787_s1 + $0x8] sm:$0xff]   ;;  %vm202_vm2 = vsmask.f32 7424 }
   0xe   : > { %592 = vmatprep.subr.bf16.mxu0 %v668_v1  ;;  %606 = vmatprep.subr.bf16.mxu1 %v668_v1  ;;  %v649_v9 = vld [vmem:[%s787_s1 + $0x2c] sm:$0xff]   ;;  %v651_v13 = vld [vmem:[%s787_s1 + $0x24] sm:$0xff]   ;;  %vm242_vm3 = vcmask 588800   ;;  %v657_v25 = vld [vmem:[%s787_s1 + $0x58] sm:$0xff]   ;;  %vm374_vm4 = vcmask 1046528   ;;  %s571_s25 = sshll.u32 %s791_s13, 4 }
   0xf   : > { %600 = vmatprep.mubr.msk.bf16.mxu0 %vm669_vm1, %v668_v1  ;;  %614 = vmatprep.mubr.msk.bf16.mxu1 %vm669_vm1, %v668_v1  ;;  %s165_s6 = scalar_lea.vmem %s786_s0, %s632_s26  ;;  %v652_v17 = vld [vmem:[%s787_s1] sm:$0xff]   ;;  %v655_v18 = vld [vmem:[%s787_s1 + $0x68] ss:$0 sps:$4 sm:$0xff]   ;;  %v658_v26 = vld [vmem:[%s787_s1 + $0x50] sm:$0xff]   ;;  %s170_s28 = scalar_lea.vmem %s789_s3, %s571_s25 }
  0x10   : > { %v653_v11 = vld [vmem:[%s165_s6] sm:$0xff]   ;;  %v654_v12 = vld [vmem:[%s165_s6 + $0x8] ss:$0 sps:$4 sm:$0x11]   ;;  %v409_v22 = vsel %vm246_vm0, %v655_v18, 0 }
  0x11   : > { %593 = vmatpush3.bf16.msra.mxu0 %v645_v5  ;;  %607 = vmatpush3.bf16.msra.mxu1 %v646_v6  ;;  %v204_v14 = vshrl.u32 %v653_v11, 16  ;;  %v206_v15 = vshll.u32 %v653_v11, 16  ;;  %v211_v16 = vshll.u32 %v654_v12, 16  ;;  %v656_v24 = vld [vmem:[%s787_s1 + $0x60] sm:$0xff]   ;;  %v659_v27 = vld [vmem:[%s787_s1 + $0x48] sm:$0xff]   ;;  %v375_v28 = vrot.slane %v653_v11, 1 }
  0x12   : > { %594 = vmatprep.subr.bf16.mxu0 %v668_v1  ;;  %608 = vmatprep.subr.bf16.mxu1 %v668_v1  ;;  %v376_v29 = vrot.slane %v654_v12, 1  ;;  %v568_v41 = vld [vmem:[%s788_s2] ss:$0 sm:$0xff] }
  0x13   : > { %v208_v19 = vrot.slane %v206_v15, 1  ;;  %v213_v20 = vrot.slane %v211_v16, 1 }
  0x14   : > { %v377_v30 = vsel %vm374_vm4, %v375_v28, %v376_v29 }
  0x15   : > { %595 = vmatpush3.bf16.msra.mxu0 %v647_v7  ;;  %609 = vmatpush3.bf16.msra.mxu1 %v648_v8  ;;  %v209_v21 = vor.u32 %v208_v19, %v204_v14 }
  0x16   : > { %596 = vmatprep.subr.bf16.mxu0 %v668_v1  ;;  %610 = vmatprep.subr.bf16.mxu1 %v668_v1 }
  0x17   : > { %v214_v23 = vsel %vm202_vm2, %v209_v21, %v213_v20 }
  0x19   : > { %597 = vmatpush3.bf16.msra.mxu0 %v649_v9  ;;  %611 = vmatpush3.bf16.msra.mxu1 %v650_v10 }
  0x1a   : > { %598 = vmatprep.subr.bf16.mxu0 %v668_v1  ;;  %612 = vmatprep.subr.bf16.mxu1 %v668_v1 }
  0x1d   : > { %599 = vmatpush3.bf16.msra.mxu0 %v651_v13  ;;  %613 = vmatpush3.bf16.msra.mxu1 %v652_v17 }
  0x1e   : > { %618 = vmatprep.subr.bf16.mxu0 %v668_v1 }
  0x20   : > { %601 = vmatmul.mubr.msk.bf16.vlgmr.msra.gmra.mxu0 %vm242_vm3, %v214_v23  ;;  %615 = vmatmul.mubr.msk.bf16.vlgmr.msra.gmra.mxu1 %vm242_vm3, %v653_v11 }
  0x21   : > { %619 = vmatpush3.bf16.msra.mxu0 %v409_v22  ;;  %628 = vmatprep.mubr.msk.bf16.mxu0 %vm669_vm1, %v668_v1 }
  0x22   : > { %620 = vmatprep.subr.bf16.mxu0 %v668_v1 }
  0x25   : > { %621 = vmatpush3.bf16.msra.mxu0 %v656_v24 }
  0x26   : > { %622 = vmatprep.subr.bf16.mxu0 %v668_v1 }
  0x29   : > { %623 = vmatpush3.bf16.msra.mxu0 %v657_v25 }
  0x2a   : > { %624 = vmatprep.subr.bf16.mxu0 %v668_v1 }
  0x2d   : > { %625 = vmatpush3.bf16.msra.mxu0 %v658_v26 }
  0x2e   : > { %626 = vmatprep.subr.bf16.mxu0 %v668_v1 }
  0x31   : > { %627 = vmatpush3.bf16.msra.mxu0 %v659_v27 }
  0x34   : > { %629 = vmatmul.mubr.msk.bf16.vlgmr.msra.gmra.mxu0 %vm242_vm3, %v377_v30 }
  0xe0   : > { %v284_v31 = vpop.f32.mrf.mxu0  ;;  %v357_v32 = vpop.f32.mrf.mxu1 }
  0xe1   : > { %v358_v39 = vadd.f32 %v357_v32, %v284_v31 }
  0xe2   : > { %v602_v33 = vpop.f32.mrf.mxu0  ;;  %v616_v34 = vpop.f32.mrf.mxu1 }
  0xe4   : > { %v287_v35 = vpop.f32.mrf.mxu0  ;;  %v360_v36 = vpop.f32.mrf.mxu1 }
  0xe5   : > { %v361_v44 = vadd.f32 %v360_v36, %v287_v35 }
  0xe6   : > { %v603_v37 = vpop.f32.mrf.mxu0  ;;  %v617_v38 = vpop.f32.mrf.mxu1 }
  0xf4   : > { %v445_v40 = vpop.f32.mrf.mxu0 }
  0xf5   : > { %v452_v42 = vadd.f32 %v445_v40, %v358_v39 }
  0xf6   : > { %v630_v43 = vpop.f32.mrf.mxu0 }
  0xf7   : > { %v461_v45 = vadd.f32 %v568_v41, %v452_v42 }
  0xf8   : > { %v448_v46 = vpop.f32.mrf.mxu0 }
  0xf9   : > { %v463_v47 = vmax.f32 %v461_v45, 0.0  ;;  %v453_v48 = vadd.f32 %v448_v46, %v361_v44 }
  0xfa   : > { %v631_v49 = vpop.f32.mrf.mxu0 }
  0xfb   : > { %465 = vst [vmem:[%s170_s28] sm:$0xff] %v463_v47  ;;  %v462_v50 = vadd.f32 %v568_v41, %v453_v48 }
  0xfd   : > { %v464_v51 = vmax.f32 %v462_v50, 0.0 }
  0xff   : > { %466 = vst [vmem:[%s170_s28 + $0x8] sm:$0xff] %v464_v51 }
 0x100 PF: > { %s13_s12 = sadd.s32 1, %s666_s12  }
 0x101   : > { %p10_p4 = scmp.ge.s32.totalorder %s13_s12, 4  }
 0x103   :  { %12 = sbr.rel (!%p10_p4) target bundleno = 1 (0x1), region = 64 }

</bundles_post_ra>
